<compile_context>
chip_gen: v7x
topology: tpu7x:2x2x1
jax: 0.10.0
libtpu: 0.0.40
codegen_flags: <defaults>
</compile_context>

<pallas_src>
import jax
import jax.numpy as jnp
from jax.experimental import pallas as pl
from jax.experimental.pallas import tpu as pltpu

# ---- model hyper-params (the PyTorch script reads these from globals) -------
BASE_FT_CNT = 32   # encoder.fc.in_features
DENSE_1 = 64
DENSE_2 = 32
DENSE_3 = 16
# dropout p is irrelevant in eval mode.


# -----------------------------------------------------------------------------
# Kernel
# -----------------------------------------------------------------------------
def _fused_kernel(x_ref, wpe_ref, be_ref,
                  w1_ref, b1_ref, w2_ref, b2_ref,
                  w3_ref, b3_ref, w4_ref, b4_ref, o_ref):
    # x tile in its source dtype (no in-kernel astype / f32 copy); all MXU
    # contractions accumulate in f32 via preferred_element_type.
    x = x_ref[...]                                                    # (TB, C*H*W)

    # Encoder stand-in: global-average-pool folded into the projection weights
    # at param-prep time -> single MXU contraction, no cross-lane (XLU) mean.
    f = jnp.dot(x, wpe_ref[...],
                preferred_element_type=jnp.float32) + be_ref[...]     # (TB, F)

    # Classification head (dropout == identity in eval mode).  Activations are
    # cast to the (tiny) weight dtype so each dot is a native single-dtype pass.
    wdt = w1_ref.dtype
    h = jnp.maximum(jnp.dot(f.astype(wdt), w1_ref[...],
                            preferred_element_type=jnp.float32) + b1_ref[...], 0.0)
    h = jnp.maximum(jnp.dot(h.astype(wdt), w2_ref[...],
                            preferred_element_type=jnp.float32) + b2_ref[...], 0.0)
    h = jnp.maximum(jnp.dot(h.astype(wdt), w3_ref[...],
                            preferred_element_type=jnp.float32) + b3_ref[...], 0.0)

    # Final layer computed in transposed ("NT") orientation: (1, D3) x (TB, D3)^T
    # -> the per-sample probabilities land lane-packed in a (1, TB) row, giving
    # compact HBM writes (4 bytes/sample) with no explicit transpose op.
    logit = jax.lax.dot_general(
        w4_ref[...], h.astype(w4_ref.dtype), (((1,), (1,)), ((), ())),
        preferred_element_type=jnp.float32) + b4_ref[...]             # (1, TB)
    o_ref[0] = jax.nn.sigmoid(logit)


# -----------------------------------------------------------------------------
# Tiling / VMEM budgeting
# -----------------------------------------------------------------------------
def _default_vmem_limit():
    """Per-generation VMEM limit: ~3/4 of physical, capped at 96 MiB
    (=> ~96 MiB on v5e/v6e's 128 MiB, ~48 MiB on v7x's 64 MiB)."""
    try:
        physical = int(pltpu.get_tpu_info().vmem_capacity_bytes)
    except Exception:
        physical = 64 * 1024 * 1024          # conservative fallback (v7x per-TC)
    return int(min(physical * 3 // 4, 96 * 1024 * 1024))


def _choose_batch_tile(batch, row_bytes, *, resident_bytes, vmem_limit):
    """VMEM-aware batch tile: resident weights + double-buffered x tiles +
    output/activation slack must fit under `vmem_limit`."""
    if batch <= 16:
        return batch                                       # single full block
    slack = 4 * 1024 * 1024                                # acts, outputs, internal scratch
    x_budget = max(vmem_limit - resident_bytes - slack, 1024 * 1024)
    tb = int(x_budget // (2 * max(int(row_bytes), 1)))     # double-buffered x tiles
    tb = min(tb, 1024, batch)                              # diminishing returns past ~1K rows
    if tb >= batch:
        return batch
    if batch >= 256:
        # v7x: keep >= 2 grid steps so both TensorCores get work.
        tb = min(tb, max(128, pl.cdiv(batch, 2)))
    if tb >= 128:
        tb = (tb // 128) * 128                             # lane-aligned rows (packed output)
    else:
        tb = max(16, (tb // 16) * 16)                      # bf16 packs 16 sublanes / vreg
    return tb


# -----------------------------------------------------------------------------
# Param prep (one-time, hoisted off the per-call path) + forward wrapper
# -----------------------------------------------------------------------------
def prepare_params(params, spatial_hw, dtype=jnp.bfloat16):
    """Fold the 1/HW global-average-pool into the encoder projection and cast
    the resident weights once (biases stay f32; accumulation is f32)."""
    inv = 1.0 / float(spatial_hw)
    w_pool_enc = jnp.repeat(params["w_enc"].astype(jnp.float32) * inv,
                            spatial_hw, axis=0).astype(dtype)         # (C*HW, F)
    return dict(
        wpe=w_pool_enc,
        be=params["b_enc"].astype(jnp.float32),
        w1=params["w1"].astype(dtype), b1=params["b1"].astype(jnp.float32),
        w2=params["w2"].astype(dtype), b2=params["b2"].astype(jnp.float32),
        w3=params["w3"].astype(dtype), b3=params["b3"].astype(jnp.float32),
        w4=params["w4"].T.astype(dtype),                   # (1, D3) row for the NT final dot
        b4=params["b4"].astype(jnp.float32),               # (1, 1)
    )


def classification_model_forward(x_nchw, prepared, *, batch_tile=None,
                                 vmem_limit_bytes=None):
    """x_nchw: [B, C, H, W] -> [B, 1] f32 sigmoid probabilities."""
    B, C, H, W = x_nchw.shape
    CHW = C * H * W

    x2d = x_nchw.reshape(B, CHW)                           # lane-dense 2-D slab
    wdt = prepared["wpe"].dtype
    if x2d.dtype != wdt:
        # Match the resident-weight dtype so the big contraction is a native
        # single-dtype MXU pass (bf16 params => bf16 x tile, half HBM reads).
        x2d = x2d.astype(wdt)

    weights = (prepared["wpe"], prepared["be"],
               prepared["w1"], prepared["b1"],
               prepared["w2"], prepared["b2"],
               prepared["w3"], prepared["b3"],
               prepared["w4"], prepared["b4"])

    if vmem_limit_bytes is None:
        vmem_limit_bytes = _default_vmem_limit()
    resident_bytes = sum(int(a.size) * a.dtype.itemsize for a in weights)
    row_bytes = CHW * x2d.dtype.itemsize
    tb = (batch_tile if batch_tile is not None else
          _choose_batch_tile(B, row_bytes,
                             resident_bytes=resident_bytes,
                             vmem_limit=vmem_limit_bytes))
    tb = min(int(tb), B)
    num_tiles = pl.cdiv(B, tb)

    def const_spec(a):
        # Constant block index -> DMA'd once, stays resident across the grid.
        return pl.BlockSpec(a.shape, lambda i: (0,) * a.ndim)

    in_specs = ([pl.BlockSpec((tb, CHW), lambda i: (i, 0))]
                + [const_spec(a) for a in weights])
    out_specs = pl.BlockSpec((1, 1, tb), lambda i: (i, 0, 0))

    flops = 2 * B * (CHW * BASE_FT_CNT + BASE_FT_CNT * DENSE_1
                     + DENSE_1 * DENSE_2 + DENSE_2 * DENSE_3 + DENSE_3)
    bytes_accessed = (int(x2d.size) * x2d.dtype.itemsize
                      + resident_bytes
                      + num_tiles * tb * 4)

    out_tiles = pl.pallas_call(
        _fused_kernel,
        grid=(num_tiles,),
        in_specs=in_specs,
        out_specs=out_specs,
        out_shape=jax.ShapeDtypeStruct((num_tiles, 1, tb), jnp.float32),
        compiler_params=pltpu.CompilerParams(
            # "parallel" marks the batch axis shardable across TensorCores
            # (portable across v5e / v6e / v7x).
            dimension_semantics=("parallel",),
            vmem_limit_bytes=int(vmem_limit_bytes),
        ),
        cost_estimate=pl.CostEstimate(
            flops=int(flops),
            transcendentals=int(B),
            bytes_accessed=int(bytes_accessed),
        ),
    )(x2d, *weights)

    # Lane-packed rows -> (B, 1); padded boundary rows (if any) are dropped.
    return out_tiles.reshape(-1)[:B].reshape(B, 1)


# -----------------------------------------------------------------------------
# Params + pure-JAX reference
# -----------------------------------------------------------------------------
def init_params(key, in_channels):
    """Deterministic parameter init (weights stored already transposed: [in, out])."""
    ks = jax.random.split(key, 10)

    def lin(kw, kb, fan_in, fan_out):
        bound = 1.0 / jnp.sqrt(fan_in)
        w = jax.random.uniform(kw, (fan_in, fan_out), jnp.float32, -bound, bound)
        b = jax.random.uniform(kb, (1, fan_out), jnp.float32, -bound, bound)
        return w, b

    w_enc, b_enc = lin(ks[0], ks[1], in_channels, BASE_FT_CNT)
    w1, b1 = lin(ks[2], ks[3], BASE_FT_CNT, DENSE_1)
    w2, b2 = lin(ks[4], ks[5], DENSE_1, DENSE_2)
    w3, b3 = lin(ks[6], ks[7], DENSE_2, DENSE_3)
    w4, b4 = lin(ks[8], ks[9], DENSE_3, 1)
    return dict(w_enc=w_enc, b_enc=b_enc, w1=w1, b1=b1, w2=w2, b2=b2,
                w3=w3, b3=b3, w4=w4, b4=b4)


def _reference_forward(x_nchw, p):
    """Module-faithful pure-JAX reference (mean-pool -> linear stem -> MLP head)."""
    hp = jax.lax.Precision.HIGHEST
    B, C, H, W = x_nchw.shape
    pooled = jnp.mean(x_nchw.astype(jnp.float32).reshape(B, C, H * W), axis=-1)
    f = jnp.dot(pooled, p["w_enc"], precision=hp) + p["b_enc"]
    h = jnp.maximum(jnp.dot(f, p["w1"], precision=hp) + p["b1"], 0.0)
    h = jnp.maximum(jnp.dot(h, p["w2"], precision=hp) + p["b2"], 0.0)
    h = jnp.maximum(jnp.dot(h, p["w3"], precision=hp) + p["b3"], 0.0)
    return jax.nn.sigmoid(jnp.dot(h, p["w4"], precision=hp) + p["b4"])


# -----------------------------------------------------------------------------
if __name__ == "__main__":
    key = jax.random.PRNGKey(0)
    k_x, k_p, k_x2 = jax.random.split(key, 3)

    # Small shapes consistent with the module (batch=2, channels=4, 16x16 spatial).
    B, C, H, W = 2, 4, 16, 16
    x = jax.random.normal(k_x, (B, C, H, W), dtype=jnp.float32)
    params = init_params(k_p, C)
    ref = _reference_forward(x, params)

    # f32-prepared params: tightest check against the pure-JAX reference.
    prep_f32 = prepare_params(params, H * W, dtype=jnp.float32)
    out = jax.block_until_ready(classification_model_forward(x, prep_f32))
    assert out.shape == (B, 1)
    assert bool(jnp.all(jnp.isfinite(out)))
    assert jnp.allclose(out, ref, atol=2e-3, rtol=2e-3), (out, ref)

    # bf16-prepared params + bf16 activations: native bf16 MXU path (half HBM
    # traffic for x); MXU default precision rounds operands to bf16 anyway.
    prep_bf16 = prepare_params(params, H * W, dtype=jnp.bfloat16)
    out_bf16 = jax.block_until_ready(
        classification_model_forward(x.astype(jnp.bfloat16), prep_bf16))
    assert out_bf16.shape == (B, 1)
    assert jnp.allclose(out_bf16, ref, atol=2e-2, rtol=2e-2)

    # Batch-tiled grid path: grid > 1, resident weights, partial boundary tile,
    # lane-packed per-tile output rows.
    B2 = 40
    x_big = jax.random.normal(k_x2, (B2, C, H, W), dtype=jnp.float32)
    out_big = jax.block_until_ready(
        classification_model_forward(x_big, prep_f32, batch_tile=16))
    ref_big = _reference_forward(x_big, params)
    assert out_big.shape == (B2, 1)
    assert jnp.allclose(out_big, ref_big, atol=2e-3, rtol=2e-3)

    print("KERNEL_OK")
</pallas_src>

<mosaic_0001>
module attributes {stable_mosaic.version = 11 : i64} {
  func.func @_fused_kernel(%arg0: i32, %arg1: memref<2x1024xf32, #tpu.memory_space<vmem>>, %arg2: memref<1024x32xf32, #tpu.memory_space<vmem>>, %arg3: memref<1x32xf32, #tpu.memory_space<vmem>>, %arg4: memref<32x64xf32, #tpu.memory_space<vmem>>, %arg5: memref<1x64xf32, #tpu.memory_space<vmem>>, %arg6: memref<64x32xf32, #tpu.memory_space<vmem>>, %arg7: memref<1x32xf32, #tpu.memory_space<vmem>>, %arg8: memref<32x16xf32, #tpu.memory_space<vmem>>, %arg9: memref<1x16xf32, #tpu.memory_space<vmem>>, %arg10: memref<1x16xf32, #tpu.memory_space<vmem>>, %arg11: memref<1x1xf32, #tpu.memory_space<vmem>>, %arg12: memref<1x1x2xf32, #tpu.memory_space<vmem>>) attributes {dimension_semantics = [#tpu.dimension_semantics<parallel>], iteration_bounds = array<i64: 1>, scalar_prefetch = 0 : i64, scratch_operands = 0 : i64, tpu.core_type = #tpu.core_type<tc>, window_params = [{transform_indices = @transform_0, window_bounds = array<i64: 2, 1024>}, {pipeline_mode = #tpu.pipeline_mode<synchronous>, transform_indices = @transform_1, window_bounds = array<i64: 1024, 32>}, {pipeline_mode = #tpu.pipeline_mode<synchronous>, transform_indices = @transform_2, window_bounds = array<i64: 1, 32>}, {pipeline_mode = #tpu.pipeline_mode<synchronous>, transform_indices = @transform_3, window_bounds = array<i64: 32, 64>}, {pipeline_mode = #tpu.pipeline_mode<synchronous>, transform_indices = @transform_4, window_bounds = array<i64: 1, 64>}, {pipeline_mode = #tpu.pipeline_mode<synchronous>, transform_indices = @transform_5, window_bounds = array<i64: 64, 32>}, {pipeline_mode = #tpu.pipeline_mode<synchronous>, transform_indices = @transform_6, window_bounds = array<i64: 1, 32>}, {pipeline_mode = #tpu.pipeline_mode<synchronous>, transform_indices = @transform_7, window_bounds = array<i64: 32, 16>}, {pipeline_mode = #tpu.pipeline_mode<synchronous>, transform_indices = @transform_8, window_bounds = array<i64: 1, 16>}, {pipeline_mode = #tpu.pipeline_mode<synchronous>, transform_indices = @transform_9, window_bounds = array<i64: 1, 16>}, {pipeline_mode = #tpu.pipeline_mode<synchronous>, transform_indices = @transform_10, window_bounds = array<i64: 1, 1>}, {transform_indices = @transform_11, window_bounds = array<i64: 1, 1, 2>}]} {
    %c0 = arith.constant 0 : index
    %c0_0 = arith.constant 0 : index
    %0 = vector.load %arg1[%c0, %c0_0] : memref<2x1024xf32, #tpu.memory_space<vmem>>, vector<2x1024xf32>
    %c0_1 = arith.constant 0 : index
    %c0_2 = arith.constant 0 : index
    %1 = vector.load %arg2[%c0_1, %c0_2] : memref<1024x32xf32, #tpu.memory_space<vmem>>, vector<1024x32xf32>
    %cst = arith.constant dense<0.000000e+00> : vector<2x32xf32>
    %2 = tpu.matmul %0, %1, %cst {dimension_numbers = #tpu.dot_dimension_numbers<[1], [0], [0], [1], [0, 0, 1, 1], [], []>} : vector<2x1024xf32>, vector<1024x32xf32>, vector<2x32xf32> -> vector<2x32xf32>
    %c0_3 = arith.constant 0 : index
    %c0_4 = arith.constant 0 : index
    %3 = vector.load %arg3[%c0_3, %c0_4] : memref<1x32xf32, #tpu.memory_space<vmem>>, vector<1x32xf32>
    %4 = vector.broadcast %3 : vector<1x32xf32> to vector<2x32xf32>
    %5 = arith.addf %2, %4 : vector<2x32xf32>
    %c0_5 = arith.constant 0 : index
    %c0_6 = arith.constant 0 : index
    %6 = vector.load %arg4[%c0_5, %c0_6] : memref<32x64xf32, #tpu.memory_space<vmem>>, vector<32x64xf32>
    %cst_7 = arith.constant dense<0.000000e+00> : vector<2x64xf32>
    %7 = tpu.matmul %5, %6, %cst_7 {dimension_numbers = #tpu.dot_dimension_numbers<[1], [0], [0], [1], [0, 0, 1, 1], [], []>} : vector<2x32xf32>, vector<32x64xf32>, vector<2x64xf32> -> vector<2x64xf32>
    %c0_8 = arith.constant 0 : index
    %c0_9 = arith.constant 0 : index
    %8 = vector.load %arg5[%c0_8, %c0_9] : memref<1x64xf32, #tpu.memory_space<vmem>>, vector<1x64xf32>
    %9 = vector.broadcast %8 : vector<1x64xf32> to vector<2x64xf32>
    %10 = arith.addf %7, %9 : vector<2x64xf32>
    %cst_10 = arith.constant 0.000000e+00 : f32
    %11 = vector.broadcast %cst_10 : f32 to vector<2x64xf32>
    %12 = arith.maximumf %10, %11 : vector<2x64xf32>
    %c0_11 = arith.constant 0 : index
    %c0_12 = arith.constant 0 : index
    %13 = vector.load %arg6[%c0_11, %c0_12] : memref<64x32xf32, #tpu.memory_space<vmem>>, vector<64x32xf32>
    %cst_13 = arith.constant dense<0.000000e+00> : vector<2x32xf32>
    %14 = tpu.matmul %12, %13, %cst_13 {dimension_numbers = #tpu.dot_dimension_numbers<[1], [0], [0], [1], [0, 0, 1, 1], [], []>} : vector<2x64xf32>, vector<64x32xf32>, vector<2x32xf32> -> vector<2x32xf32>
    %c0_14 = arith.constant 0 : index
    %c0_15 = arith.constant 0 : index
    %15 = vector.load %arg7[%c0_14, %c0_15] : memref<1x32xf32, #tpu.memory_space<vmem>>, vector<1x32xf32>
    %16 = vector.broadcast %15 : vector<1x32xf32> to vector<2x32xf32>
    %17 = arith.addf %14, %16 : vector<2x32xf32>
    %cst_16 = arith.constant 0.000000e+00 : f32
    %18 = vector.broadcast %cst_16 : f32 to vector<2x32xf32>
    %19 = arith.maximumf %17, %18 : vector<2x32xf32>
    %c0_17 = arith.constant 0 : index
    %c0_18 = arith.constant 0 : index
    %20 = vector.load %arg8[%c0_17, %c0_18] : memref<32x16xf32, #tpu.memory_space<vmem>>, vector<32x16xf32>
    %cst_19 = arith.constant dense<0.000000e+00> : vector<2x16xf32>
    %21 = tpu.matmul %19, %20, %cst_19 {dimension_numbers = #tpu.dot_dimension_numbers<[1], [0], [0], [1], [0, 0, 1, 1], [], []>} : vector<2x32xf32>, vector<32x16xf32>, vector<2x16xf32> -> vector<2x16xf32>
    %c0_20 = arith.constant 0 : index
    %c0_21 = arith.constant 0 : index
    %22 = vector.load %arg9[%c0_20, %c0_21] : memref<1x16xf32, #tpu.memory_space<vmem>>, vector<1x16xf32>
    %23 = vector.broadcast %22 : vector<1x16xf32> to vector<2x16xf32>
    %24 = arith.addf %21, %23 : vector<2x16xf32>
    %cst_22 = arith.constant 0.000000e+00 : f32
    %25 = vector.broadcast %cst_22 : f32 to vector<2x16xf32>
    %26 = arith.maximumf %24, %25 : vector<2x16xf32>
    %c0_23 = arith.constant 0 : index
    %c0_24 = arith.constant 0 : index
    %27 = vector.load %arg10[%c0_23, %c0_24] : memref<1x16xf32, #tpu.memory_space<vmem>>, vector<1x16xf32>
    %cst_25 = arith.constant dense<0.000000e+00> : vector<1x2xf32>
    %28 = tpu.matmul %27, %26, %cst_25 {dimension_numbers = #tpu.dot_dimension_numbers<[1], [1], [0], [0], [0, 0, 1, 0], [], []>} : vector<1x16xf32>, vector<2x16xf32>, vector<1x2xf32> -> vector<1x2xf32>
    %c0_26 = arith.constant 0 : index
    %c0_27 = arith.constant 0 : index
    %29 = vector.load %arg11[%c0_26, %c0_27] : memref<1x1xf32, #tpu.memory_space<vmem>>, vector<1x1xf32>
    %30 = vector.broadcast %29 : vector<1x1xf32> to vector<1x2xf32>
    %31 = arith.addf %28, %30 : vector<1x2xf32>
    %32 = arith.negf %31 : vector<1x2xf32>
    %33 = math.exp %32 : vector<1x2xf32>
    %cst_28 = arith.constant 1.000000e+00 : f32
    %34 = vector.broadcast %cst_28 : f32 to vector<1x2xf32>
    %35 = arith.addf %34, %33 : vector<1x2xf32>
    %36 = arith.divf %34, %35 : vector<1x2xf32>
    %c0_29 = arith.constant 0 : index
    %c0_30 = arith.constant 0 : index
    %c0_31 = arith.constant 0 : index
    %37 = vector.load %arg12[%c0_29, %c0_30, %c0_31] : memref<1x1x2xf32, #tpu.memory_space<vmem>>, vector<1x1x2xf32>
    %38 = vector.shape_cast %37 : vector<1x1x2xf32> to vector<1x2xf32>
    %39 = vector.shape_cast %36 : vector<1x2xf32> to vector<1x1x2xf32>
    tpu.vector_store %arg12[%c0_29, %c0_30, %c0_31], %39 {strides = array<i32>} : memref<1x1x2xf32, #tpu.memory_space<vmem>>, vector<1x1x2xf32>,
    return
  }
  func.func @transform_0(%arg0: i32) -> (i32, i32) {
    %c0_i32 = arith.constant 0 : i32
    %c0_i32_0 = arith.constant 0 : i32
    return %arg0, %c0_i32 : i32, i32
  }
  func.func @transform_1(%arg0: i32) -> (i32, i32) {
    %c0_i32 = arith.constant 0 : i32
    %c0_i32_0 = arith.constant 0 : i32
    %c0_i32_1 = arith.constant 0 : i32
    return %c0_i32, %c0_i32_0 : i32, i32
  }
  func.func @transform_2(%arg0: i32) -> (i32, i32) {
    %c0_i32 = arith.constant 0 : i32
    %c0_i32_0 = arith.constant 0 : i32
    %c0_i32_1 = arith.constant 0 : i32
    return %c0_i32, %c0_i32_0 : i32, i32
  }
  func.func @transform_3(%arg0: i32) -> (i32, i32) {
    %c0_i32 = arith.constant 0 : i32
    %c0_i32_0 = arith.constant 0 : i32
    %c0_i32_1 = arith.constant 0 : i32
    return %c0_i32, %c0_i32_0 : i32, i32
  }
  func.func @transform_4(%arg0: i32) -> (i32, i32) {
    %c0_i32 = arith.constant 0 : i32
    %c0_i32_0 = arith.constant 0 : i32
    %c0_i32_1 = arith.constant 0 : i32
    return %c0_i32, %c0_i32_0 : i32, i32
  }
  func.func @transform_5(%arg0: i32) -> (i32, i32) {
    %c0_i32 = arith.constant 0 : i32
    %c0_i32_0 = arith.constant 0 : i32
    %c0_i32_1 = arith.constant 0 : i32
    return %c0_i32, %c0_i32_0 : i32, i32
  }
  func.func @transform_6(%arg0: i32) -> (i32, i32) {
    %c0_i32 = arith.constant 0 : i32
    %c0_i32_0 = arith.constant 0 : i32
    %c0_i32_1 = arith.constant 0 : i32
    return %c0_i32, %c0_i32_0 : i32, i32
  }
  func.func @transform_7(%arg0: i32) -> (i32, i32) {
    %c0_i32 = arith.constant 0 : i32
    %c0_i32_0 = arith.constant 0 : i32
    %c0_i32_1 = arith.constant 0 : i32
    return %c0_i32, %c0_i32_0 : i32, i32
  }
  func.func @transform_8(%arg0: i32) -> (i32, i32) {
    %c0_i32 = arith.constant 0 : i32
    %c0_i32_0 = arith.constant 0 : i32
    %c0_i32_1 = arith.constant 0 : i32
    return %c0_i32, %c0_i32_0 : i32, i32
  }
  func.func @transform_9(%arg0: i32) -> (i32, i32) {
    %c0_i32 = arith.constant 0 : i32
    %c0_i32_0 = arith.constant 0 : i32
    %c0_i32_1 = arith.constant 0 : i32
    return %c0_i32, %c0_i32_0 : i32, i32
  }
  func.func @transform_10(%arg0: i32) -> (i32, i32) {
    %c0_i32 = arith.constant 0 : i32
    %c0_i32_0 = arith.constant 0 : i32
    %c0_i32_1 = arith.constant 0 : i32
    return %c0_i32, %c0_i32_0 : i32, i32
  }
  func.func @transform_11(%arg0: i32) -> (i32, i32, i32) {
    %c0_i32 = arith.constant 0 : i32
    %c0_i32_0 = arith.constant 0 : i32
    %c0_i32_1 = arith.constant 0 : i32
    return %arg0, %c0_i32, %c0_i32_0 : i32, i32, i32
  }
}

</mosaic_0001>

<bundles_post_ra>
// kernel: tpu_custom_call.1
= control target key start
LH: loop header
LB: loop body
LE: loop exit
PB: predicated region body
PF: predicated region fallthrough
CT: control target
= control target key end

     0   :  { %s1839_s0 = inlined_call_operand.vmem [shape: f32[2,1024], index: 0, kind: input, shape index: {}]   ;;  %s1840_s1 = inlined_call_operand.vmem [shape: f32[1024,32], index: 1, kind: input, shape index: {}]   ;;  %s1841_s2 = inlined_call_operand.vmem [shape: f32[1,32], index: 2, kind: input, shape index: {}]   ;;  %s1842_s3 = inlined_call_operand.vmem [shape: f32[32,64], index: 3, kind: input, shape index: {}]   ;;  %s1843_s4 = inlined_call_operand.vmem [shape: f32[1,64], index: 4, kind: input, shape index: {}]   ;;  %s1844_s5 = inlined_call_operand.vmem [shape: f32[64,32], index: 5, kind: input, shape index: {}]   ;;  %s1845_s6 = inlined_call_operand.vmem [shape: f32[1,32], index: 6, kind: input, shape index: {}]   ;;  %s1846_s7 = inlined_call_operand.vmem [shape: f32[32,16], index: 7, kind: input, shape index: {}]   ;;  %s1847_s8 = inlined_call_operand.vmem [shape: f32[1,16], index: 8, kind: input, shape index: {}]   ;;  %s1848_s9 = inlined_call_operand.vmem [shape: f32[1,16], index: 9, kind: input, shape index: {}]   ;;  %s1849_s10 = inlined_call_operand.<no memory space> [shape: f32[1,1], index: 10, kind: input, shape index: {}]   ;;  %s1850_s11 = inlined_call_operand.hbm [shape: f32[1,1,2], index: 11, kind: output, shape index: {}]  }
   0x1   :  { %v16_v0 = vstv %s1849_s10 }
   0x2   :  { %17 = vst [vmem:[#allocation2] sm:$0x1] %v16_v0 }
   0x3   :  { %v59_v1 = vld [vmem:[%s1840_s1 + $0x80] sm:$0xff]  ;;  %v60_v2 = vld [vmem:[%s1840_s1 + $0x88] sm:$0xff]  ;;  %v61_v12 = vld [vmem:[%s1840_s1 + $0x90] sm:$0xff]  ;;  %v1279_v48 = vmov 1983009808   ;;  %v184_v50 = vlaneseq }
   0x4   :  { %v43_v3 = vld [vmem:[%s1840_s1] sm:$0xff]  ;;  %v1090_v4 = vpack.c.bf16 %v60_v2, %v59_v1  ;;  %v44_v5 = vld [vmem:[%s1840_s1 + $0x8] sm:$0xff]  ;;  %v62_v14 = vld [vmem:[%s1840_s1 + $0x98] sm:$0xff]  ;;  %v182_v49 = vunpack.c.l.s4 %v1279_v48 }
   0x5   :  { %v91_v6 = vld [vmem:[%s1840_s1 + $0x180] sm:$0xff]  ;;  %v92_v7 = vld [vmem:[%s1840_s1 + $0x188] sm:$0xff]  ;;  %v1092_v8 = vpack.c.bf16 %v44_v5, %v43_v3  ;;  %v45_v15 = vld [vmem:[%s1840_s1 + $0x10] sm:$0xff]  ;;  %v1094_v17 = vpack.c.bf16 %v62_v14, %v61_v12  ;;  %v1474_v1 = vshrl.u32 %v184_v50, 7 }
   0x6   :  { %v1122_v9 = vpack.c.bf16 %v92_v7, %v91_v6  ;;  %v75_v10 = vld [vmem:[%s1840_s1 + $0x100] sm:$0xff]  ;;  %v76_v11 = vld [vmem:[%s1840_s1 + $0x108] sm:$0xff]  ;;  %1091 = vmatprep.subr.bf16.mxu0 %v1090_v4  ;;  %v46_v16 = vld [vmem:[%s1840_s1 + $0x18] sm:$0xff]  ;;  %v183_v0 = vunpack.c.0.s8 %v182_v49 }
   0x7   :  { %v1124_v13 = vpack.c.bf16 %v76_v11, %v75_v10  ;;  %1093 = vmatpush3.bf16.msra.mxu0 %v1092_v8  ;;  %v1096_v18 = vpack.c.bf16 %v46_v16, %v45_v15  ;;  %v93_v19 = vld [vmem:[%s1840_s1 + $0x190] sm:$0xff]  ;;  %v94_v20 = vld [vmem:[%s1840_s1 + $0x198] sm:$0xff]  ;;  %v63_v24 = vld [vmem:[%s1840_s1 + $0xa0] sm:$0xff] }
   0x8   :  { %1123 = vmatprep.subr.bf16.mxu1 %v1122_v9  ;;  %v77_v21 = vld [vmem:[%s1840_s1 + $0x110] sm:$0xff]  ;;  %v1126_v22 = vpack.c.bf16 %v94_v20, %v93_v19  ;;  %v78_v23 = vld [vmem:[%s1840_s1 + $0x118] sm:$0xff]  ;;  %v64_v25 = vld [vmem:[%s1840_s1 + $0xa8] sm:$0xff]  ;;  %1095 = vmatprep.subr.bf16.mxu0 %v1094_v17  ;;  %v1501_v14 = vsub.s32 %v183_v0, %v1474_v1 }
   0x9   :  { %1125 = vmatpush3.bf16.msra.mxu1 %v1124_v13  ;;  %v1128_v26 = vpack.c.bf16 %v78_v23, %v77_v21  ;;  %v1098_v27 = vpack.c.bf16 %v64_v25, %v63_v24  ;;  %v47_v28 = vld [vmem:[%s1840_s1 + $0x20] sm:$0xff]  ;;  %v48_v29 = vld [vmem:[%s1840_s1 + $0x28] sm:$0xff]  ;;  %v65_v36 = vld [vmem:[%s1840_s1 + $0xb0] sm:$0xff] }
   0xa   :  { %v95_v30 = vld [vmem:[%s1840_s1 + $0x1a0] sm:$0xff]  ;;  %1127 = vmatprep.subr.bf16.mxu1 %v1126_v22  ;;  %v96_v31 = vld [vmem:[%s1840_s1 + $0x1a8] sm:$0xff]  ;;  %v1100_v34 = vpack.c.bf16 %v48_v29, %v47_v28  ;;  %v66_v37 = vld [vmem:[%s1840_s1 + $0xb8] sm:$0xff] }
   0xb   :  { %v79_v32 = vld [vmem:[%s1840_s1 + $0x120] sm:$0xff]  ;;  %v80_v33 = vld [vmem:[%s1840_s1 + $0x128] sm:$0xff]  ;;  %1097 = vmatpush3.bf16.msra.mxu0 %v1096_v18  ;;  %v1130_v35 = vpack.c.bf16 %v96_v31, %v95_v30  ;;  %v49_v38 = vld [vmem:[%s1840_s1 + $0x30] sm:$0xff]  ;;  %v1102_v40 = vpack.c.bf16 %v66_v37, %v65_v36 }
   0xc   :  { %1099 = vmatprep.subr.bf16.mxu0 %v1098_v27  ;;  %v1132_v39 = vpack.c.bf16 %v80_v33, %v79_v32  ;;  %v50_v41 = vld [vmem:[%s1840_s1 + $0x38] sm:$0xff]  ;;  %v97_v42 = vld [vmem:[%s1840_s1 + $0x1b0] sm:$0xff]  ;;  %v67_v47 = vld [vmem:[%s1840_s1 + $0xc0] sm:$0xff] }
   0xd   :  { %1129 = vmatpush3.bf16.msra.mxu1 %v1128_v26  ;;  %v98_v43 = vld [vmem:[%s1840_s1 + $0x1b8] sm:$0xff]  ;;  %v81_v45 = vld [vmem:[%s1840_s1 + $0x130] sm:$0xff]  ;;  %v68_v51 = vld [vmem:[%s1840_s1 + $0xc8] sm:$0xff]  ;;  %v1104_v52 = vpack.c.bf16 %v50_v41, %v49_v38 }
   0xe   :  { %1131 = vmatprep.subr.bf16.mxu1 %v1130_v35  ;;  %v1134_v44 = vpack.c.bf16 %v98_v43, %v97_v42  ;;  %v82_v46 = vld [vmem:[%s1840_s1 + $0x138] sm:$0xff]  ;;  %v99_v53 = vld [vmem:[%s1840_s1 + $0x1c0] sm:$0xff]  ;;  %v100_v54 = vld [vmem:[%s1840_s1 + $0x1c8] sm:$0xff]  ;;  %v1106_v56 = vpack.c.bf16 %v68_v51, %v67_v47 }
   0xf   :  { %1101 = vmatpush3.bf16.msra.mxu0 %v1100_v34  ;;  %v1136_v55 = vpack.c.bf16 %v82_v46, %v81_v45  ;;  %v51_v57 = vld [vmem:[%s1840_s1 + $0x40] sm:$0xff]  ;;  %v52_v58 = vld [vmem:[%s1840_s1 + $0x48] sm:$0xff]  ;;  %v1138_v60 = vpack.c.bf16 %v100_v54, %v99_v53  ;;  %v69_v62 = vld [vmem:[%s1840_s1 + $0xd0] sm:$0xff] }
  0x10   :  { %1103 = vmatprep.subr.bf16.mxu0 %v1102_v40  ;;  %v83_v59 = vld [vmem:[%s1840_s1 + $0x140] sm:$0xff]  ;;  %v84_v61 = vld [vmem:[%s1840_s1 + $0x148] sm:$0xff]  ;;  %v70_v63 = vld [vmem:[%s1840_s1 + $0xd8] sm:$0xff]  ;;  %v1108_v4 = vpack.c.bf16 %v52_v58, %v51_v57 }
  0x11   :  { %1133 = vmatpush3.bf16.msra.mxu1 %v1132_v39  ;;  %v101_v2 = vld [vmem:[%s1840_s1 + $0x1d0] sm:$0xff]  ;;  %v102_v3 = vld [vmem:[%s1840_s1 + $0x1d8] sm:$0xff]  ;;  %v1140_v5 = vpack.c.bf16 %v84_v61, %v83_v59  ;;  %v1110_v6 = vpack.c.bf16 %v70_v63, %v69_v62  ;;  %v71_v12 = vld [vmem:[%s1840_s1 + $0xe0] sm:$0xff] }
  0x12   :  { %1135 = vmatprep.subr.bf16.mxu1 %v1134_v44  ;;  %v53_v7 = vld [vmem:[%s1840_s1 + $0x50] sm:$0xff]  ;;  %v54_v8 = vld [vmem:[%s1840_s1 + $0x58] sm:$0xff]  ;;  %v1142_v10 = vpack.c.bf16 %v102_v3, %v101_v2  ;;  %v72_v13 = vld [vmem:[%s1840_s1 + $0xe8] sm:$0xff] }
  0x13   :  { %1105 = vmatpush3.bf16.msra.mxu0 %v1104_v52  ;;  %v85_v9 = vld [vmem:[%s1840_s1 + $0x150] sm:$0xff]  ;;  %v86_v11 = vld [vmem:[%s1840_s1 + $0x158] sm:$0xff]  ;;  %v103_v15 = vld [vmem:[%s1840_s1 + $0x1e0] sm:$0xff]  ;;  %v1112_v17 = vpack.c.bf16 %v54_v8, %v53_v7  ;;  %v1114_v20 = vpack.c.bf16 %v72_v13, %v71_v12 }
  0x14   :  { %1107 = vmatprep.subr.bf16.mxu0 %v1106_v56  ;;  %v104_v16 = vld [vmem:[%s1840_s1 + $0x1e8] sm:$0xff]  ;;  %v55_v18 = vld [vmem:[%s1840_s1 + $0x60] sm:$0xff]  ;;  %v1144_v19 = vpack.c.bf16 %v86_v11, %v85_v9  ;;  %v73_v26 = vld [vmem:[%s1840_s1 + $0xf0] sm:$0xff] }
  0x15   :  { %1137 = vmatpush3.bf16.msra.mxu1 %v1136_v55  ;;  %v56_v21 = vld [vmem:[%s1840_s1 + $0x68] sm:$0xff]  ;;  %v87_v22 = vld [vmem:[%s1840_s1 + $0x160] sm:$0xff]  ;;  %v1146_v24 = vpack.c.bf16 %v104_v16, %v103_v15  ;;  %v74_v27 = vld [vmem:[%s1840_s1 + $0xf8] sm:$0xff] }
  0x16   :  { %1139 = vmatprep.subr.bf16.mxu1 %v1138_v60  ;;  %v41_v23 = vld [vmem:[%s1839_s0] sm:$0xff]  ;;  %v88_v25 = vld [vmem:[%s1840_s1 + $0x168] sm:$0xff]  ;;  %v105_v30 = vld [vmem:[%s1840_s1 + $0x1f0] sm:$0xff]  ;;  %v1116_v32 = vpack.c.bf16 %v56_v21, %v55_v18  ;;  %v1118_v36 = vpack.c.bf16 %v74_v27, %v73_v26 }
  0x17   :  { %1109 = vmatpush3.bf16.msra.mxu0 %v1108_v4  ;;  %v187_v28 = vrot.slane %v41_v23, %v1501_v14  ;;  %v180_v29 = vcombine.high %v41_v23, %v41_v23  ;;  %v106_v31 = vld [vmem:[%s1840_s1 + $0x1f8] sm:$0xff]  ;;  %v1148_v35 = vpack.c.bf16 %v88_v25, %v87_v22  ;;  %v57_v37 = vld [vmem:[%s1840_s1 + $0x70] sm:$0xff]  ;;  %v123_v42 = vld [vmem:[%s1840_s1 + $0x280] sm:$0xff] }
  0x18   :  { %1111 = vmatprep.subr.bf16.mxu0 %v1110_v6  ;;  %v58_v38 = vld [vmem:[%s1840_s1 + $0x78] sm:$0xff]  ;;  %v89_v39 = vld [vmem:[%s1840_s1 + $0x170] sm:$0xff]  ;;  %v1150_v40 = vpack.c.bf16 %v106_v31, %v105_v30  ;;  %v124_v43 = vld [vmem:[%s1840_s1 + $0x288] sm:$0xff] }
  0x19   :  { %1141 = vmatpush3.bf16.msra.mxu1 %v1140_v5  ;;  %v195_v33 = vcombine.high %v187_v28, %v187_v28  ;;  %v194_v34 = vrot.slane %v180_v29, %v1501_v14  ;;  %v90_v41 = vld [vmem:[%s1840_s1 + $0x178] sm:$0xff]  ;;  %v155_v45 = vld [vmem:[%s1840_s1 + $0x380] sm:$0xff]  ;;  %v156_v46 = vld [vmem:[%s1840_s1 + $0x388] sm:$0xff]  ;;  %v1120_v47 = vpack.c.bf16 %v58_v38, %v57_v37  ;;  %v1154_v49 = vpack.c.bf16 %v124_v43, %v123_v42 }
  0x1a   :  { %1143 = vmatprep.subr.bf16.mxu1 %v1142_v10  ;;  %v1152_v48 = vpack.c.bf16 %v90_v41, %v89_v39  ;;  %v107_v50 = vld [vmem:[%s1840_s1 + $0x200] sm:$0xff]  ;;  %v108_v51 = vld [vmem:[%s1840_s1 + $0x208] sm:$0xff]  ;;  %v1186_v53 = vpack.c.bf16 %v156_v46, %v155_v45  ;;  %v125_v55 = vld [vmem:[%s1840_s1 + $0x290] sm:$0xff] }
  0x1b   :  { %1113 = vmatpush3.bf16.msra.mxu0 %v1112_v17  ;;  %286 = vmatprep.mubr.f32.mxu0 %v195_v33  ;;  %v196_v44 = vcombine.high %v194_v34, %v194_v34  ;;  %v139_v52 = vld [vmem:[%s1840_s1 + $0x300] sm:$0xff]  ;;  %v140_v54 = vld [vmem:[%s1840_s1 + $0x308] sm:$0xff]  ;;  %v126_v56 = vld [vmem:[%s1840_s1 + $0x298] sm:$0xff]  ;;  %v1156_v59 = vpack.c.bf16 %v108_v51, %v107_v50 }
  0x1c   :  { %1115 = vmatprep.subr.bf16.mxu0 %v1114_v20  ;;  %v157_v57 = vld [vmem:[%s1840_s1 + $0x390] sm:$0xff]  ;;  %v158_v58 = vld [vmem:[%s1840_s1 + $0x398] sm:$0xff]  ;;  %v1188_v60 = vpack.c.bf16 %v140_v54, %v139_v52  ;;  %v1158_v61 = vpack.c.bf16 %v126_v56, %v125_v55  ;;  %v127_v4 = vld [vmem:[%s1840_s1 + $0x2a0] sm:$0xff] }
  0x1d   :  { %1145 = vmatpush3.bf16.msra.mxu1 %v1144_v19  ;;  %356 = vmatprep.mubr.f32.mxu1 %v196_v44  ;;  %v109_v62 = vld [vmem:[%s1840_s1 + $0x210] sm:$0xff]  ;;  %v110_v63 = vld [vmem:[%s1840_s1 + $0x218] sm:$0xff]  ;;  %v1190_v2 = vpack.c.bf16 %v158_v58, %v157_v57  ;;  %v128_v5 = vld [vmem:[%s1840_s1 + $0x2a8] sm:$0xff] }
  0x1e   :  { %1147 = vmatprep.subr.bf16.mxu1 %v1146_v24  ;;  %v141_v0 = vld [vmem:[%s1840_s1 + $0x310] sm:$0xff]  ;;  %v142_v3 = vld [vmem:[%s1840_s1 + $0x318] sm:$0xff]  ;;  %v159_v6 = vld [vmem:[%s1840_s1 + $0x3a0] sm:$0xff]  ;;  %v1160_v8 = vpack.c.bf16 %v110_v63, %v109_v62  ;;  %v1162_v10 = vpack.c.bf16 %v128_v5, %v127_v4 }
  0x1f   :  { %1117 = vmatpush3.bf16.msra.mxu0 %v1116_v32  ;;  %v160_v7 = vld [vmem:[%s1840_s1 + $0x3a8] sm:$0xff]  ;;  %v1192_v9 = vpack.c.bf16 %v142_v3, %v141_v0  ;;  %v111_v11 = vld [vmem:[%s1840_s1 + $0x220] sm:$0xff]  ;;  %v129_v17 = vld [vmem:[%s1840_s1 + $0x2b0] sm:$0xff] }
  0x20   :  { %1119 = vmatprep.subr.bf16.mxu0 %v1118_v36  ;;  %v112_v12 = vld [vmem:[%s1840_s1 + $0x228] sm:$0xff]  ;;  %v143_v13 = vld [vmem:[%s1840_s1 + $0x320] sm:$0xff]  ;;  %v1194_v15 = vpack.c.bf16 %v160_v7, %v159_v6  ;;  %v130_v18 = vld [vmem:[%s1840_s1 + $0x2b8] sm:$0xff] }
  0x21   :  { %1149 = vmatpush3.bf16.msra.mxu1 %v1148_v35  ;;  %v144_v16 = vld [vmem:[%s1840_s1 + $0x328] sm:$0xff]  ;;  %v161_v19 = vld [vmem:[%s1840_s1 + $0x3b0] sm:$0xff]  ;;  %v162_v20 = vld [vmem:[%s1840_s1 + $0x3b8] sm:$0xff]  ;;  %v1164_v21 = vpack.c.bf16 %v112_v12, %v111_v11  ;;  %v1166_v24 = vpack.c.bf16 %v130_v18, %v129_v17 }
  0x22   :  { %1151 = vmatprep.subr.bf16.mxu1 %v1150_v40  ;;  %v113_v22 = vld [vmem:[%s1840_s1 + $0x230] sm:$0xff]  ;;  %v1196_v23 = vpack.c.bf16 %v144_v16, %v143_v13  ;;  %v114_v25 = vld [vmem:[%s1840_s1 + $0x238] sm:$0xff]  ;;  %v131_v29 = vld [vmem:[%s1840_s1 + $0x2c0] sm:$0xff] }
  0x23   :  { %1121 = vmatpush3.bf16.msra.mxu0 %v1120_v47  ;;  %v145_v26 = vld [vmem:[%s1840_s1 + $0x330] sm:$0xff]  ;;  %v146_v27 = vld [vmem:[%s1840_s1 + $0x338] sm:$0xff]  ;;  %v132_v30 = vld [vmem:[%s1840_s1 + $0x2c8] sm:$0xff] }
  0x24   :  { %1155 = vmatprep.subr.bf16.mxu0 %v1154_v49  ;;  %v163_v31 = vld [vmem:[%s1840_s1 + $0x3c0] sm:$0xff]  ;;  %v164_v32 = vld [vmem:[%s1840_s1 + $0x3c8] sm:$0xff] }
  0x25   :  { %1153 = vmatpush3.bf16.msra.mxu1 %v1152_v48  ;;  %v42_v33 = vld [vmem:[%s1839_s0 + $0x8] sm:$0xff] }
  0x26   :  { %1187 = vmatprep.subr.bf16.mxu1 %v1186_v53  ;;  %287 = vmatmul.mubr.f32.vlgmr.msra.gmra.mrb[0].mxu0 %v187_v28  ;;  %v1198_v28 = vpack.c.bf16 %v162_v20, %v161_v19 }
  0x27   :  { %1157 = vmatpush3.bf16.msra.mxu0 %v1156_v59 }
  0x28   :  { %357 = vmatmul.mubr.f32.vlgmr.msra.gmra.mrb[0].mxu1 %v194_v34  ;;  %1159 = vmatprep.subr.bf16.mxu0 %v1158_v61 }
  0x29   :  { %1189 = vmatpush3.bf16.msra.mxu1 %v1188_v60 }
  0x2a   :  { %1191 = vmatprep.subr.bf16.mxu1 %v1190_v2 }
  0x2b   :  { %1161 = vmatpush3.bf16.msra.mxu0 %v1160_v8 }
  0x2c   :  { %1163 = vmatprep.subr.bf16.mxu0 %v1162_v10 }
  0x2d   :  { %1193 = vmatpush3.bf16.msra.mxu1 %v1192_v9 }
  0x2e   :  { %1195 = vmatprep.subr.bf16.mxu1 %v1194_v15 }
  0x2f   :  { %18 = vsyncpa [#allocation4], 0  ;;  %1165 = vmatpush3.bf16.msra.mxu0 %v1164_v21  ;;  %v1168_v34 = vpack.c.bf16 %v114_v25, %v113_v22  ;;  %v1662_v35 = vrot.slane %v42_v33, %v1501_v14  ;;  %v197_v36 = vcombine.high %v42_v33, %v42_v33  ;;  %v1200_v37 = vpack.c.bf16 %v146_v27, %v145_v26  ;;  %v115_v39 = vld [vmem:[%s1840_s1 + $0x240] sm:$0xff]  ;;  %v116_v40 = vld [vmem:[%s1840_s1 + $0x248] sm:$0xff] }
  0x30   :  { %1167 = vmatprep.subr.bf16.mxu0 %v1166_v24  ;;  %v1170_v38 = vpack.c.bf16 %v132_v30, %v131_v29  ;;  %v147_v41 = vld [vmem:[%s1840_s1 + $0x340] sm:$0xff]  ;;  %v1202_v42 = vpack.c.bf16 %v164_v32, %v163_v31  ;;  %v148_v43 = vld [vmem:[%s1840_s1 + $0x348] sm:$0xff]  ;;  %v133_v44 = vld [vmem:[%s1840_s1 + $0x2d0] sm:$0xff]  ;;  %v1172_v50 = vpack.c.bf16 %v116_v40, %v115_v39  ;;  %v1280_v25 = vmov 0.0|0.0  }
  0x31   :  { %1197 = vmatpush3.bf16.msra.mxu1 %v1196_v23  ;;  %v134_v45 = vld [vmem:[%s1840_s1 + $0x2d8] sm:$0xff]  ;;  %v212_v46 = vcombine.high %v1662_v35, %v1662_v35  ;;  %v211_v47 = vrot.slane %v197_v36, %v1501_v14  ;;  %v165_v48 = vld [vmem:[%s1840_s1 + $0x3d0] sm:$0xff]  ;;  %v1204_v52 = vpack.c.bf16 %v148_v43, %v147_v41  ;;  %v135_v58 = vld [vmem:[%s1840_s1 + $0x2e0] sm:$0xff]  ;;  %vm1281_vm0 = vmmov 0  }
  0x32   :  { %1199 = vmatprep.subr.bf16.mxu1 %v1198_v28  ;;  %v166_v49 = vld [vmem:[%s1840_s1 + $0x3d8] sm:$0xff]  ;;  %v1174_v53 = vpack.c.bf16 %v134_v45, %v133_v44  ;;  %v117_v14 = vld [vmem:[%s1840_s1 + $0x250] sm:$0xff]  ;;  %v136_v59 = vld [vmem:[%s1840_s1 + $0x2e8] sm:$0xff]  ;;  %v1282_v29 = vmov 0.0   ;;  %vm513_vm1 = vcmask 261120   ;;  %vm603_vm2 = vcmask 523264  }
  0x33   :  { %1169 = vmatpush3.bf16.msra.mxu0 %v1168_v34  ;;  %426 = vmatprep.mubr.f32.mxu0 %v212_v46  ;;  %v213_v51 = vcombine.high %v211_v47, %v211_v47  ;;  %v118_v54 = vld [vmem:[%s1840_s1 + $0x258] sm:$0xff]  ;;  %v149_v55 = vld [vmem:[%s1840_s1 + $0x350] sm:$0xff]  ;;  %v1206_v56 = vpack.c.bf16 %v166_v49, %v165_v48  ;;  %v167_v60 = vld [vmem:[%s1840_s1 + $0x3e0] sm:$0xff]  ;;  %v1178_v0 = vpack.c.bf16 %v136_v59, %v135_v58  ;;  %vm774_vm3 = vcmask 130048  }
  0x34   :  { %1171 = vmatprep.subr.bf16.mxu0 %v1170_v38  ;;  %v150_v57 = vld [vmem:[%s1840_s1 + $0x358] sm:$0xff]  ;;  %v168_v61 = vld [vmem:[%s1840_s1 + $0x3e8] sm:$0xff]  ;;  %v1176_v62 = vpack.c.bf16 %v118_v54, %v117_v14  ;;  %v119_v2 = vld [vmem:[%s1840_s1 + $0x260] sm:$0xff]  ;;  %vm857_vm4 = vcmask 8192  }
  0x35   :  { %1201 = vmatpush3.bf16.msra.mxu1 %v1200_v37  ;;  %496 = vmatprep.mubr.f32.mxu1 %v213_v51  ;;  %v1208_v63 = vpack.c.bf16 %v150_v57, %v149_v55  ;;  %v120_v3 = vld [vmem:[%s1840_s1 + $0x268] sm:$0xff]  ;;  %v151_v4 = vld [vmem:[%s1840_s1 + $0x360] sm:$0xff]  ;;  %v1210_v5 = vpack.c.bf16 %v168_v61, %v167_v60  ;;  %v137_v7 = vld [vmem:[%s1840_s1 + $0x2f0] sm:$0xff] }
  0x36   :  { %1203 = vmatprep.subr.bf16.mxu1 %v1202_v42  ;;  %v152_v6 = vld [vmem:[%s1840_s1 + $0x368] sm:$0xff]  ;;  %v138_v8 = vld [vmem:[%s1840_s1 + $0x2f8] sm:$0xff]  ;;  %v169_v9 = vld [vmem:[%s1840_s1 + $0x3f0] sm:$0xff]  ;;  %v1180_v11 = vpack.c.bf16 %v120_v3, %v119_v2 }
  0x37   :  { %1173 = vmatpush3.bf16.msra.mxu0 %v1172_v50  ;;  %v170_v10 = vld [vmem:[%s1840_s1 + $0x3f8] sm:$0xff]  ;;  %v1212_v12 = vpack.c.bf16 %v152_v6, %v151_v4  ;;  %v1182_v13 = vpack.c.bf16 %v138_v8, %v137_v7  ;;  %v121_v15 = vld [vmem:[%s1840_s1 + $0x270] sm:$0xff]  ;;  %v502_v22 = vld [vmem:[%s1842_s3] sm:$0xff] }
  0x38   :  { %1175 = vmatprep.subr.bf16.mxu0 %v1174_v53  ;;  %v122_v16 = vld [vmem:[%s1840_s1 + $0x278] sm:$0xff]  ;;  %v1214_v17 = vpack.c.bf16 %v170_v10, %v169_v9  ;;  %v153_v18 = vld [vmem:[%s1840_s1 + $0x370] sm:$0xff]  ;;  %v503_v23 = vld [vmem:[%s1842_s3 + $0x8] sm:$0xff] }
  0x39   :  { %1205 = vmatpush3.bf16.msra.mxu1 %v1204_v52  ;;  %v154_v19 = vld [vmem:[%s1840_s1 + $0x378] sm:$0xff]  ;;  %v1184_v20 = vpack.c.bf16 %v122_v16, %v121_v15  ;;  %v1219_v24 = vpack.c.bf16 %v503_v23, %v502_v22  ;;  %v504_v26 = vld [vmem:[%s1842_s3 + $0x10] sm:$0xff]  ;;  %v588_v30 = vld [vmem:[%s1844_s5] sm:$0xff] }
  0x3a   :  { %1207 = vmatprep.subr.bf16.mxu1 %v1206_v56  ;;  %v1216_v21 = vpack.c.bf16 %v154_v19, %v153_v18  ;;  %v505_v27 = vld [vmem:[%s1842_s3 + $0x18] sm:$0xff]  ;;  %v589_v31 = vld [vmem:[%s1844_s5 + $0x8] sm:$0xff]  ;;  %v590_v32 = vld [vmem:[%s1844_s5 + $0x10] sm:$0xff] }
  0x3b   :  { %1177 = vmatpush3.bf16.msra.mxu0 %v1176_v62  ;;  %v1222_v28 = vpack.c.bf16 %v505_v27, %v504_v26  ;;  %v1225_v33 = vpack.c.bf16 %v589_v31, %v588_v30  ;;  %v591_v34 = vld [vmem:[%s1844_s5 + $0x18] sm:$0xff]  ;;  %v592_v36 = vld [vmem:[%s1844_s5 + $0x20] sm:$0xff]  ;;  %v593_v37 = vld [vmem:[%s1844_s5 + $0x28] sm:$0xff] }
  0x3c   :  { %1179 = vmatprep.subr.bf16.mxu0 %v1178_v0  ;;  %v1231_v38 = vpack.c.bf16 %v593_v37, %v592_v36  ;;  %v873_v40 = vld [vmem:[%s1841_s2] ss:$0 sm:$0xff]  ;;  %v594_v55 = vld [vmem:[%s1844_s5 + $0x30] sm:$0xff]  ;;  %v595_v56 = vld [vmem:[%s1844_s5 + $0x38] sm:$0xff] }
  0x3d   :  { %1209 = vmatpush3.bf16.msra.mxu1 %v1208_v63  ;;  %v1234_v57 = vpack.c.bf16 %v595_v56, %v594_v55  ;;  %v678_v58 = vld [vmem:[%s1846_s7] sm:$0xff]  ;;  %v679_v59 = vld [vmem:[%s1846_s7 + $0x8] sm:$0xff]  ;;  %v680_v3 = vld [vmem:[%s1846_s7 + $0x10] sm:$0xff] }
  0x3e   :  { %1211 = vmatprep.subr.bf16.mxu1 %v1210_v5  ;;  %v1237_v60 = vpack.c.bf16 %v679_v59, %v678_v58  ;;  %v874_v61 = vld [vmem:[%s1843_s4] ss:$0 sm:$0xff]  ;;  %v681_v4 = vld [vmem:[%s1846_s7 + $0x18] sm:$0xff] }
  0x3f   :  { %1181 = vmatpush3.bf16.msra.mxu0 %v1180_v11  ;;  %v1240_v5 = vpack.c.bf16 %v681_v4, %v680_v3  ;;  %v876_v6 = vld [vmem:[%s1845_s6] ss:$0 sm:$0xff] }
  0x40   :  { %1183 = vmatprep.subr.bf16.mxu0 %v1182_v13  ;;  %v764_v11 = vld [vmem:[#allocation2] sm:$0x1] }
  0x41   :  { %1213 = vmatpush3.bf16.msra.mxu1 %v1212_v12  ;;  %v1283_v12 = vmov 0   ;;  %v878_v13 = vld [vmem:[%s1847_s8] ss:$0 sm:$0xff]  ;;  %s1284_s8 = smov [#allocation3]  }
  0x42   :  { %1215 = vmatprep.subr.bf16.mxu1 %v1214_v17  ;;  %1248 = vset.pattern.permute.xlu0 %v1283_v12  ;;  %v763_v19 = vld [vmem:[%s1848_s9] sm:$0x1]  ;;  %s865_s27 = sshll.u32 %s1284_s8, 4  ;;  %s866_s27 = int_to_ptr.vmem [resolvable:$true] %s865_s27 }
  0x43   :  { %1185 = vmatpush3.bf16.msra.mxu0 %v1184_v20  ;;  %767 = vperm.xlu0 %1248, %v764_v11   ;;  %v772_v20 = vsub.s32 0, %v1474_v1  ;;  %s1255_s9 = scalar_lea.vmem %s866_s27, 16  ;;  %s1259_s10 = scalar_lea.vmem %s866_s27, 32 }
  0x44   :  { %1218 = vmatprep.subr.bf16.mxu0 %v1280_v25  ;;  %p1256_p0 = scmp.ne.s32.totalorder %s866_s27, %s1255_s9  ;;  %p1260_p1 = scmp.lt.s32.totalorder %s866_s27, %s866_s27 }
  0x45   :  { %1217 = vmatpush3.bf16.msra.mxu1 %v1216_v21  ;;  %p1261_p2 = scmp.lt.s32.totalorder %s1259_s10, %s1255_s9 }
  0x46   :  { %427 = vmatmul.mubr.f32.vlgmr.msra.gmra.mrb[2].mxu0 %v1662_v35  ;;  %1224 = vmatprep.subr.bf16.mxu1 %v1280_v25  ;;  %v1228_v35 = vpack.c.bf16 %v591_v34, %v590_v32 }
  0x47   :  { %1220 = vmatpush3.bf16.msra.mxu0 %v1219_v24  ;;  %1052 = vmatprep.mubr.msk.f32.mxu0 %vm1281_vm0, %v1282_v29  ;;  %p1262_p3 = por %p1261_p2, %p1260_p1 }
  0x48   :  { %497 = vmatmul.mubr.f32.vlgmr.msra.gmra.mrb[2].mxu1 %v211_v47  ;;  %1221 = vmatprep.subr.bf16.mxu0 %v1280_v25 }
  0x49   :  { %1071 = vmatprep.mubr.msk.f32.mxu1 %vm1281_vm0, %v1282_v29  ;;  %1226 = vmatpush3.bf16.msra.mxu1 %v1225_v33  ;;  %p1263_p4 = pnand %p1262_p3, %p1256_p0 }
  0x4a   :  { %1227 = vmatprep.subr.bf16.mxu1 %v1280_v25 }
  0x4b   :  { %1223 = vmatpush3.bf16.msra.mxu0 %v1222_v28 }
  0x4c   :  { %1236 = vmatprep.subr.bf16.mxu0 %v1280_v25 }
  0x4d   :  { %1229 = vmatpush3.bf16.msra.mxu1 %v1228_v35 }
  0x4e   :  { %1230 = vmatprep.subr.bf16.mxu1 %v1280_v25 }
  0x51   :  { %1232 = vmatpush3.bf16.msra.mxu1 %v1231_v38 }
  0x52   :  { %1233 = vmatprep.subr.bf16.mxu1 %v1280_v25 }
  0x55   :  { %1235 = vmatpush3.bf16.msra.mxu1 %v1234_v57 }
  0xc2   :  { %v768_v21 = vpop.permute.xlu0 %767 }
  0xc3   :  { %v773_v22 = vrot.slane %v768_v21, %v772_v20 }
  0xf9   :  { %v915_v39 = vpop.f32.mrb[0].mxu0 }
  0xfa   :  { %v916_v41 = vpop.f32.mrb[1].mxu0 }
  0xfb   :  { %v950_v42 = vpop.f32.mrb[0].mxu1  ;;  %v917_v43 = vadd.f32 %v916_v41, %v915_v39 }
  0xfc   :  { %v951_v44 = vpop.f32.mrb[1].mxu1 }
  0xfd   :  { %v952_v45 = vadd.f32 %v951_v44, %v950_v42  ;;  %v289_v46 = vadd.f32 %v917_v43, %v873_v40 }
  0xff   :  { %v359_v47 = vadd.f32 %v952_v45, %v289_v46 }
 0x119   :  { %v985_v48 = vpop.f32.mrb[2].mxu0 }
 0x11a   :  { %v986_v49 = vpop.f32.mrb[3].mxu0 }
 0x11b   :  { %v1020_v50 = vpop.f32.mrb[2].mxu1  ;;  %v987_v51 = vadd.f32 %v986_v49, %v985_v48 }
 0x11c   :  { %v1021_v52 = vpop.f32.mrb[3].mxu1 }
 0x11d   :  { %v1022_v53 = vadd.f32 %v1021_v52, %v1020_v50  ;;  %v429_v14 = vadd.f32 %v987_v51, %v359_v47 }
 0x11f   :  { %v499_v54 = vadd.f32 %v1022_v53, %v429_v14 }
 0x121   :  { %1053 = vmatmul.mubr.msk.f32.vlgmr.msra.gmra.mrb[4].mxu0 %vm513_vm1, %v499_v54 }
 0x122   :  { %1082 = vmatprep.mubr.msk.f32.mxu0 %vm1281_vm0, %v1282_v29  ;;  %1238 = vmatpush3.bf16.msra.mxu0 %v1237_v60 }
 0x123   :  { %1239 = vmatprep.subr.bf16.mxu0 %v1280_v25 }
 0x126   :  { %1241 = vmatpush3.bf16.msra.mxu0 %v1240_v5 }
 0x127   :  { %1085 = vmatprep.subr.mxu0 %v1282_v29 }
 0x1f4   :  { %v583_v62 = vpop.f32.mrb[4].mxu0 }
 0x1f5   :  { %v584_v63 = vadd.f32 %v874_v61, %v583_v62  ;;  %v1054_v0 = vpop.f32.mrb[5].mxu0 }
 0x1f7   :  { %v587_v2 = vmax.f32 %v584_v63, 0.0 }
 0x1f9   :  { %1072 = vmatmul.mubr.msk.f32.vlgmr.msra.gmra.mrb[4].mxu1 %vm603_vm2, %v587_v2 }
 0x2cc   :  { %v673_v7 = vpop.f32.mrb[4].mxu1 }
 0x2cd   :  { %v674_v8 = vadd.f32 %v876_v6, %v673_v7  ;;  %v1073_v9 = vpop.f32.mrb[5].mxu1 }
 0x2cf   :  { %v677_v10 = vmax.f32 %v674_v8, 0.0 }
 0x2d1   :  { %1083 = vmatmul.mubr.msk.f32.vlgmr.msra.gmra.mrb[6].mxu0 %vm513_vm1, %v677_v10 }
 0x2d2   :  { %1087 = vmatprep.mubr.msk.f32.mxu0 %vm1281_vm0, %v1282_v29 }
 0x3a4   :  { %v758_v15 = vpop.f32.mrb[6].mxu0 }
 0x3a5   :  { %v759_v16 = vadd.f32 %v878_v13, %v758_v15  ;;  %v1084_v17 = vpop.f32.mrb[7].mxu0 }
 0x3a7   :  { %v762_v18 = vmax.f32 %v759_v16, 0.0 }
 0x3a9   :  { %1086 = vmatpush3.xpose.msk.msra.mxu0 %vm774_vm3, %v762_v18 }
 0x3ac   :  { %1088 = vmatmul.mubr.msk.f32.vlgmr.msra.gmra.mrb[8].mxu0 %vm774_vm3, %v763_v19 }
 0x47f   :  { %v847_v23 = vpop.f32.mrb[8].mxu0 }
 0x480   :  { %v848_v24 = vadd.f32 %v847_v23, %v773_v22  ;;  %v1089_v25 = vpop.f32.mrb[9].mxu0 }
 0x482   :  { %v882_v26 = vmul.f32 -1.442695, %v848_v24 }
 0x484   :  { %1251 = vpow2.f32 %v882_v26 }
 0x48e   :  { %v1252_v27 = vpop.eup %1251 }
 0x48f   :  { %v854_v28 = vadd.f32 1.0, %v1252_v27 }
 0x491   :  { %1253 = vrcp.f32 %v854_v28 }
 0x49b   :  { %v1254_v29 = vpop.eup %1253 }
 0x49c   :  { %858 = vst.msk [vmem:[#allocation3] sm:$0x1] %vm857_vm4, %v1254_v29 }
 0x49d   :  { %1266 = shalt.err (!%p1263_p4)
}
 0x49e   :  { %s1267_s30 = scalar_lea.hbm %s1850_s11, 16 }
 0x49f   :  { %p1268_p5 = scmp.ne.s32.totalorder %s1850_s11, %s1267_s30  ;;  %p1271_p6 = scmp.lt.u32.totalorder %s1267_s30, %s1850_s11 }
 0x4a1   :  { %p1273_p7 = pnand %p1271_p6, %p1268_p5 }
 0x4a3   :  { %1276 = shalt.err (!%p1273_p7)
}
 0x4a4   :  { %868 = dma.vmem_to_hbm [thread:$0]  %s866_s27, 16, %s1850_s11, [#allocation4]  }
 0x4a5   :  { %1277 = dma.done.wait [#allocation4], 16  }
 0x4a6   :  { %1278 = vsyncadd [#allocation4], 4294967280 }
 0x4a7   :  { %872 = vsyncpa [#allocation4], 1 }

</bundles_post_ra>
